<compile_context>
chip_gen: v6e
topology: v6e:2x2x1
jax: 0.10.0
libtpu: 0.0.40
codegen_flags: <defaults>
</compile_context>

<pallas_src>
import functools

import jax
import jax.numpy as jnp
from jax.experimental import pallas as pl
from jax.experimental.pallas import tpu as pltpu


# --------------------------------------------------------------------------
# helpers
# --------------------------------------------------------------------------
def _round_up(x: int, m: int) -> int:
    return ((x + m - 1) // m) * m


def _pad2d(a, rows: int, cols: int):
    r, c = a.shape
    if r == rows and c == cols:
        return a
    return jnp.pad(a, ((0, rows - r), (0, cols - c)))


def _tpu_budgets():
    """(vmem_limit_bytes, fused_weight_cap_bytes) per TPU generation."""
    vmem_cap = None
    try:
        info = pltpu.get_tpu_info()
        vmem_cap = int(getattr(info, "vmem_capacity_bytes", 0)) or None
    except Exception:
        vmem_cap = None
    if vmem_cap is None:
        vmem_cap = 64 * 1024 * 1024  # assume the smallest (v7x per-TC)
    if vmem_cap >= 96 * 1024 * 1024:
        # v5e / v6e: 128 MiB physical VMEM -> generous budgets.
        return 64 * 1024 * 1024, 24 * 1024 * 1024
    # v7x: 64 MiB per TensorCore -> stay conservative.
    return 48 * 1024 * 1024, 16 * 1024 * 1024


_VMEM_LIMIT, _FUSE_WEIGHT_CAP = _tpu_budgets()

# Resolved on the first fused call: does this Pallas accept pl.Buffered(1)?
_SINGLE_BUFFER_WEIGHTS = None


def _even_tile(dim: int, cap: int, align: int) -> int:
    """Largest tile <= cap (multiple of align) that splits dim with minimal pad."""
    full = _round_up(dim, align)
    if full <= cap:
        return full
    n_tiles = -(-full // cap)
    return _round_up(-(-dim // n_tiles), align)


def _choose_tile(dim: int, cap: int, prefer_256: bool = False) -> int:
    """Pick a lane-dense tile; prefer 256-multiples (v6e/v7x MXU width) when
    they do not increase total padding."""
    aligns = (256, 128) if (prefer_256 and dim >= 256) else (128,)
    best_t, best_pad = None, None
    for align in aligns:
        t = _even_tile(dim, cap, align)
        padded = -(-dim // t) * t
        if best_pad is None or padded < best_pad:
            best_t, best_pad = t, padded
    return best_t


def _batch_tile(batch: int, cap: int, min_tiles: int = 1) -> int:
    """Even-split batch into tiles (multiple of 8) to minimize padding."""
    n_tiles = max(-(-batch // cap), min_tiles)
    return _round_up(-(-batch // n_tiles), 8)


# --------------------------------------------------------------------------
# Fused whole-MLP kernel (activations never leave VMEM)
# --------------------------------------------------------------------------
def _fused_mlp_kernel(x_ref, w_ref, b_ref, o_ref, *, layer_dims):
    # x_ref:  (TM, K0)        padded input tile
    # w_ref:  (L, Kmax, Nmax) stacked, pre-transposed ([IN, OUT]) padded weights
    # b_ref:  (L, 1, Nmax)    stacked padded biases
    # Correctness of padding relies on zero-padded weights/biases and
    # ReLU(0) == 0, so padded lanes stay exactly zero through the stack.
    w_dtype = w_ref.dtype
    num_layers = len(layer_dims)
    act = x_ref[...]                      # layer 0 reads the input directly
    for l, (k_l, n_l) in enumerate(layer_dims):
        w = w_ref[l, :k_l, :n_l]          # static per-layer slice (no square pad)
        b = b_ref[l, :, :n_l]
        y = jnp.dot(act.astype(w_dtype), w, preferred_element_type=jnp.float32)
        y = y + b.astype(jnp.float32)
        if l < num_layers - 1:
            y = jnp.maximum(y, 0.0)
        act = y                           # carried as a value, no VMEM scratch
    o_ref[...] = act.astype(o_ref.dtype)


def mlp_fused_forward(x, w_stack, b_stack, layer_dims, output_dim,
                      vmem_limit=_VMEM_LIMIT):
    global _SINGLE_BUFFER_WEIGHTS

    batch, _ = x.shape
    num_layers, k_max, n_max = w_stack.shape
    k0 = layer_dims[0][0]
    n_last = layer_dims[-1][1]

    # >=2 "parallel" M tiles when batch is big enough so both TensorCores of a
    # v7x megacore get work; even split keeps padding minimal.
    tm = _batch_tile(batch, cap=256, min_tiles=2 if batch >= 16 else 1)
    b_pad = _round_up(batch, tm)
    xp = _pad2d(x, b_pad, k0)

    kernel = functools.partial(_fused_mlp_kernel, layer_dims=tuple(layer_dims))

    def _run(single_buffer_weights: bool):
        if single_buffer_weights:
            # Constant index_map -> resident operand; single-buffer it so the
            # weight stack occupies VMEM once instead of twice.
            w_spec = pl.BlockSpec((num_layers, k_max, n_max),
                                  lambda i: (0, 0, 0),
                                  pipeline_mode=pl.Buffered(1))
            b_spec = pl.BlockSpec((num_layers, 1, n_max),
                                  lambda i: (0, 0, 0),
                                  pipeline_mode=pl.Buffered(1))
        else:
            w_spec = pl.BlockSpec((num_layers, k_max, n_max),
                                  lambda i: (0, 0, 0))
            b_spec = pl.BlockSpec((num_layers, 1, n_max),
                                  lambda i: (0, 0, 0))
        return pl.pallas_call(
            kernel,
            out_shape=jax.ShapeDtypeStruct((b_pad, n_last), x.dtype),
            grid=(b_pad // tm,),
            in_specs=[
                pl.BlockSpec((tm, k0), lambda i: (i, 0)),
                w_spec,
                b_spec,
            ],
            out_specs=pl.BlockSpec((tm, n_last), lambda i: (i, 0)),
            compiler_params=pltpu.CompilerParams(
                dimension_semantics=("parallel",),
                vmem_limit_bytes=vmem_limit,
            ),
        )(xp, w_stack, b_stack)

    out = None
    if _SINGLE_BUFFER_WEIGHTS is not False:
        try:
            out = _run(True)
            if _SINGLE_BUFFER_WEIGHTS is None:
                out = jax.block_until_ready(out)   # one-time probe
                _SINGLE_BUFFER_WEIGHTS = True
        except Exception:
            _SINGLE_BUFFER_WEIGHTS = False
            out = None
    if out is None:
        out = _run(False)
    return out[:batch, :output_dim]


# --------------------------------------------------------------------------
# General tiled linear kernel: out = [relu](x @ W + b), W already [K, N]
# --------------------------------------------------------------------------
def _tiled_linear_kernel(x_ref, w_ref, b_ref, o_ref, acc_ref, *, apply_relu: bool):
    k = pl.program_id(2)

    @pl.when(k == 0)
    def _():
        acc_ref[...] = jnp.zeros_like(acc_ref)

    acc_ref[...] += jnp.dot(
        x_ref[...].astype(w_ref.dtype), w_ref[...],
        preferred_element_type=jnp.float32,
    )

    @pl.when(k == pl.num_programs(2) - 1)
    def _():
        y = acc_ref[...] + b_ref[...].astype(jnp.float32)
        if apply_relu:
            y = jnp.maximum(y, 0.0)
        o_ref[...] = y.astype(o_ref.dtype)


def pallas_linear_tiled(x, w_t, b, apply_relu: bool, vmem_limit=_VMEM_LIMIT):
    """x: [M, K], w_t: [K, N] (pre-transposed), b: [1, N]."""
    m, k = x.shape
    k2, n = w_t.shape
    assert k == k2 and b.shape == (1, n)

    tm = _even_tile(m, 512, 8)
    tk = _choose_tile(k, 1024, prefer_256=True)
    tn = _choose_tile(n, 512, prefer_256=True)

    mp, kp, np_ = _round_up(m, tm), _round_up(k, tk), _round_up(n, tn)
    xp = _pad2d(x, mp, kp)
    wp = _pad2d(w_t, kp, np_)
    bp = _pad2d(b, 1, np_)

    kernel = functools.partial(_tiled_linear_kernel, apply_relu=apply_relu)
    out = pl.pallas_call(
        kernel,
        out_shape=jax.ShapeDtypeStruct((mp, np_), x.dtype),
        grid=(mp // tm, np_ // tn, kp // tk),
        in_specs=[
            pl.BlockSpec((tm, tk), lambda i, j, kk: (i, kk)),
            pl.BlockSpec((tk, tn), lambda i, j, kk: (kk, j)),
            pl.BlockSpec((1, tn), lambda i, j, kk: (0, j)),
        ],
        out_specs=pl.BlockSpec((tm, tn), lambda i, j, kk: (i, j)),
        scratch_shapes=[pltpu.VMEM((tm, tn), jnp.float32)],
        compiler_params=pltpu.CompilerParams(
            dimension_semantics=("parallel", "parallel", "arbitrary"),
            vmem_limit_bytes=vmem_limit,
        ),
    )(xp, wp, bp)
    return out[:m, :n]


# --------------------------------------------------------------------------
# MLP module (JAX/Pallas equivalent of the PyTorch MLP)
# --------------------------------------------------------------------------
class MLP:
    def __init__(self, input_dim, hidden_dim, output_dim, num_layers, key,
                 param_dtype=jnp.float32):
        self.num_layers = num_layers
        self.input_dim = input_dim
        self.output_dim = output_dim

        h = [hidden_dim] * (num_layers - 1)
        dims_in = [input_dim] + h
        dims_out = h + [output_dim]

        # Parameters stored pre-transposed: W_t [in, out] (MXU RHS layout),
        # bias [1, out]. param_dtype=bfloat16 halves DMA/VMEM and uses the
        # MXU's native dtype on v6e/v7x (accumulation stays f32).
        self.params = []
        for n_in, n_out in zip(dims_in, dims_out):
            key, wk, bk = jax.random.split(key, 3)
            bound = 1.0 / (n_in ** 0.5)  # PyTorch Linear-style uniform init
            w_t = jax.random.uniform(wk, (n_in, n_out), jnp.float32, -bound, bound)
            b = jax.random.uniform(bk, (1, n_out), jnp.float32, -bound, bound)
            self.params.append((w_t.astype(param_dtype), b.astype(param_dtype)))

        # Per-layer lane-dense padded dims (multiples of 128) -- rectangular,
        # not square, so e.g. 32 -> 1024 -> 16 stacks waste no MXU FLOPs.
        self.layer_dims = tuple(
            (_round_up(n_in, 128), _round_up(n_out, 128))
            for n_in, n_out in zip(dims_in, dims_out)
        )
        k_max = max(kd for kd, _ in self.layer_dims)
        n_max = max(nd for _, nd in self.layer_dims)

        w_stack = jnp.zeros((num_layers, k_max, n_max), param_dtype)
        b_stack = jnp.zeros((num_layers, 1, n_max), param_dtype)
        for l, (w_t, b) in enumerate(self.params):
            w_stack = w_stack.at[l, : w_t.shape[0], : w_t.shape[1]].set(w_t)
            b_stack = b_stack.at[l, :, : b.shape[1]].set(b)
        self.w_stack = w_stack
        self.b_stack = b_stack

        # Resident-weight footprint (single-buffered via pl.Buffered(1));
        # threshold is per-generation so v5e/v6e fuse much larger nets.
        itemsize = jnp.dtype(param_dtype).itemsize
        weight_bytes = (w_stack.size + b_stack.size) * itemsize
        self.fused = weight_bytes <= _FUSE_WEIGHT_CAP

    def __call__(self, x):
        if self.fused:
            return mlp_fused_forward(
                x, self.w_stack, self.b_stack, self.layer_dims, self.output_dim
            )
        # Fallback: per-layer M/N/K-tiled GEMM (weights streamed from HBM).
        for i, (w_t, b) in enumerate(self.params):
            x = pallas_linear_tiled(x, w_t, b,
                                    apply_relu=(i < self.num_layers - 1))
        return x


# --------------------------------------------------------------------------
# Pure-JAX reference
# --------------------------------------------------------------------------
def mlp_reference(params, x):
    n = len(params)
    for i, (w_t, b) in enumerate(params):
        x = jnp.dot(x, w_t.astype(jnp.float32),
                    precision=jax.lax.Precision.HIGHEST) + b.astype(jnp.float32)
        if i < n - 1:
            x = jnp.maximum(x, 0.0)
    return x


if __name__ == "__main__":
    key = jax.random.PRNGKey(0)
    key, xkey, mkey = jax.random.split(key, 3)

    batch = 8
    input_dim, hidden_dim, output_dim, num_layers = 32, 64, 16, 3

    x = jax.random.normal(xkey, (batch, input_dim), jnp.float32)

    # f32 parameters (matches the PyTorch module's default dtype).
    mlp = MLP(input_dim, hidden_dim, output_dim, num_layers, mkey)
    out = jax.block_until_ready(mlp(x))
    ref = mlp_reference(mlp.params, x)
    assert out.shape == (batch, output_dim)
    assert jnp.allclose(out, ref, atol=1e-3, rtol=1e-3)

    # bf16 parameters: native MXU dtype on v6e/v7x (looser numeric tolerance).
    mlp_bf16 = MLP(input_dim, hidden_dim, output_dim, num_layers, mkey,
                   param_dtype=jnp.bfloat16)
    out_bf16 = jax.block_until_ready(mlp_bf16(x))
    ref_bf16 = mlp_reference(mlp_bf16.params, x)
    assert jnp.allclose(out_bf16, ref_bf16, atol=3e-2, rtol=3e-2)

    # Larger batch -> >=2 parallel M tiles (exercises megacore sharding path).
    key, bkey = jax.random.split(key)
    xb = jax.random.normal(bkey, (96, input_dim), jnp.float32)
    outb = jax.block_until_ready(mlp(xb))
    refb = mlp_reference(mlp.params, xb)
    assert outb.shape == (96, output_dim)
    assert jnp.allclose(outb, refb, atol=1e-3, rtol=1e-3)

    # Also exercise the general tiled fallback kernel (unaligned dims).
    key, k1, k2, k3 = jax.random.split(key, 4)
    M, K, N = 96, 200, 144
    xt = jax.random.normal(k1, (M, K), jnp.float32)
    wt = jax.random.normal(k2, (K, N), jnp.float32) * 0.05
    bt = jax.random.normal(k3, (1, N), jnp.float32)
    yt = jax.block_until_ready(pallas_linear_tiled(xt, wt, bt, apply_relu=True))
    ref_t = jnp.maximum(
        jnp.dot(xt, wt, precision=jax.lax.Precision.HIGHEST) + bt, 0.0
    )
    assert jnp.allclose(yt, ref_t, atol=1e-3, rtol=1e-3)

    print("KERNEL_OK")
</pallas_src>

<mosaic_0001>
module attributes {stable_mosaic.version = 11 : i64} {
  func.func @_fused_mlp_kernel(%arg0: i32, %arg1: memref<8x128xf32, #tpu.memory_space<vmem>>, %arg2: memref<3x128x128xf32, #tpu.memory_space<vmem>>, %arg3: memref<3x1x128xf32, #tpu.memory_space<vmem>>, %arg4: memref<8x128xf32, #tpu.memory_space<vmem>>) attributes {dimension_semantics = [#tpu.dimension_semantics<parallel>], iteration_bounds = array<i64: 1>, scalar_prefetch = 0 : i64, scratch_operands = 0 : i64, tpu.core_type = #tpu.core_type<tc>, window_params = [{transform_indices = @transform_0, window_bounds = array<i64: 8, 128>}, {pipeline_mode = #tpu.pipeline_mode<synchronous>, transform_indices = @transform_1, window_bounds = array<i64: 3, 128, 128>}, {pipeline_mode = #tpu.pipeline_mode<synchronous>, transform_indices = @transform_2, window_bounds = array<i64: 3, 1, 128>}, {transform_indices = @transform_3, window_bounds = array<i64: 8, 128>}]} {
    %c0 = arith.constant 0 : index
    %c0_0 = arith.constant 0 : index
    %0 = vector.load %arg1[%c0, %c0_0] : memref<8x128xf32, #tpu.memory_space<vmem>>, vector<8x128xf32>
    %c0_1 = arith.constant 0 : index
    %c0_2 = arith.constant 0 : index
    %c0_3 = arith.constant 0 : index
    %1 = vector.load %arg2[%c0_1, %c0_2, %c0_3] : memref<3x128x128xf32, #tpu.memory_space<vmem>>, vector<1x128x128xf32>
    %2 = vector.shape_cast %1 : vector<1x128x128xf32> to vector<128x128xf32>
    %c0_4 = arith.constant 0 : index
    %c0_5 = arith.constant 0 : index
    %c0_6 = arith.constant 0 : index
    %3 = vector.load %arg3[%c0_4, %c0_5, %c0_6] : memref<3x1x128xf32, #tpu.memory_space<vmem>>, vector<1x1x128xf32>
    %4 = vector.shape_cast %3 : vector<1x1x128xf32> to vector<1x128xf32>
    %cst = arith.constant dense<0.000000e+00> : vector<8x128xf32>
    %5 = tpu.matmul %0, %2, %cst {dimension_numbers = #tpu.dot_dimension_numbers<[1], [0], [0], [1], [0, 0, 1, 1], [], []>} : vector<8x128xf32>, vector<128x128xf32>, vector<8x128xf32> -> vector<8x128xf32>
    %6 = vector.broadcast %4 : vector<1x128xf32> to vector<8x128xf32>
    %7 = arith.addf %5, %6 : vector<8x128xf32>
    %cst_7 = arith.constant 0.000000e+00 : f32
    %8 = vector.broadcast %cst_7 : f32 to vector<8x128xf32>
    %9 = arith.maximumf %7, %8 : vector<8x128xf32>
    %c1 = arith.constant 1 : index
    %c0_8 = arith.constant 0 : index
    %c0_9 = arith.constant 0 : index
    %10 = vector.load %arg2[%c1, %c0_8, %c0_9] : memref<3x128x128xf32, #tpu.memory_space<vmem>>, vector<1x128x128xf32>
    %11 = vector.shape_cast %10 : vector<1x128x128xf32> to vector<128x128xf32>
    %c1_10 = arith.constant 1 : index
    %c0_11 = arith.constant 0 : index
    %c0_12 = arith.constant 0 : index
    %12 = vector.load %arg3[%c1_10, %c0_11, %c0_12] : memref<3x1x128xf32, #tpu.memory_space<vmem>>, vector<1x1x128xf32>
    %13 = vector.shape_cast %12 : vector<1x1x128xf32> to vector<1x128xf32>
    %cst_13 = arith.constant dense<0.000000e+00> : vector<8x128xf32>
    %14 = tpu.matmul %9, %11, %cst_13 {dimension_numbers = #tpu.dot_dimension_numbers<[1], [0], [0], [1], [0, 0, 1, 1], [], []>} : vector<8x128xf32>, vector<128x128xf32>, vector<8x128xf32> -> vector<8x128xf32>
    %15 = vector.broadcast %13 : vector<1x128xf32> to vector<8x128xf32>
    %16 = arith.addf %14, %15 : vector<8x128xf32>
    %cst_14 = arith.constant 0.000000e+00 : f32
    %17 = vector.broadcast %cst_14 : f32 to vector<8x128xf32>
    %18 = arith.maximumf %16, %17 : vector<8x128xf32>
    %c2 = arith.constant 2 : index
    %c0_15 = arith.constant 0 : index
    %c0_16 = arith.constant 0 : index
    %19 = vector.load %arg2[%c2, %c0_15, %c0_16] : memref<3x128x128xf32, #tpu.memory_space<vmem>>, vector<1x128x128xf32>
    %20 = vector.shape_cast %19 : vector<1x128x128xf32> to vector<128x128xf32>
    %c2_17 = arith.constant 2 : index
    %c0_18 = arith.constant 0 : index
    %c0_19 = arith.constant 0 : index
    %21 = vector.load %arg3[%c2_17, %c0_18, %c0_19] : memref<3x1x128xf32, #tpu.memory_space<vmem>>, vector<1x1x128xf32>
    %22 = vector.shape_cast %21 : vector<1x1x128xf32> to vector<1x128xf32>
    %cst_20 = arith.constant dense<0.000000e+00> : vector<8x128xf32>
    %23 = tpu.matmul %18, %20, %cst_20 {dimension_numbers = #tpu.dot_dimension_numbers<[1], [0], [0], [1], [0, 0, 1, 1], [], []>} : vector<8x128xf32>, vector<128x128xf32>, vector<8x128xf32> -> vector<8x128xf32>
    %24 = vector.broadcast %22 : vector<1x128xf32> to vector<8x128xf32>
    %25 = arith.addf %23, %24 : vector<8x128xf32>
    %c0_21 = arith.constant 0 : index
    %c0_22 = arith.constant 0 : index
    %26 = vector.load %arg4[%c0_21, %c0_22] : memref<8x128xf32, #tpu.memory_space<vmem>>, vector<8x128xf32>
    tpu.vector_store %arg4[%c0_21, %c0_22], %25 {strides = array<i32>} : memref<8x128xf32, #tpu.memory_space<vmem>>, vector<8x128xf32>,
    return
  }
  func.func @transform_0(%arg0: i32) -> (i32, i32) {
    %c0_i32 = arith.constant 0 : i32
    %c0_i32_0 = arith.constant 0 : i32
    return %arg0, %c0_i32 : i32, i32
  }
  func.func @transform_1(%arg0: i32) -> (i32, i32, i32) {
    %c0_i32 = arith.constant 0 : i32
    %c0_i32_0 = arith.constant 0 : i32
    %c0_i32_1 = arith.constant 0 : i32
    %c0_i32_2 = arith.constant 0 : i32
    return %c0_i32, %c0_i32_0, %c0_i32_1 : i32, i32, i32
  }
  func.func @transform_2(%arg0: i32) -> (i32, i32, i32) {
    %c0_i32 = arith.constant 0 : i32
    %c0_i32_0 = arith.constant 0 : i32
    %c0_i32_1 = arith.constant 0 : i32
    %c0_i32_2 = arith.constant 0 : i32
    return %c0_i32, %c0_i32_0, %c0_i32_1 : i32, i32, i32
  }
  func.func @transform_3(%arg0: i32) -> (i32, i32) {
    %c0_i32 = arith.constant 0 : i32
    %c0_i32_0 = arith.constant 0 : i32
    return %arg0, %c0_i32 : i32, i32
  }
}

module attributes {stable_mosaic.version = 11 : i64} {
  func.func @_fused_mlp_kernel(%arg0: i32, %arg1: memref<8x128xf32, #tpu.memory_space<vmem>>, %arg2: memref<3x128x128xf32, #tpu.memory_space<vmem>>, %arg3: memref<3x1x128xf32, #tpu.memory_space<vmem>>, %arg4: memref<8x128xf32, #tpu.memory_space<vmem>>) attributes {dimension_semantics = [#tpu.dimension_semantics<parallel>], iteration_bounds = array<i64: 1>, scalar_prefetch = 0 : i64, scratch_operands = 0 : i64, tpu.core_type = #tpu.core_type<tc>, window_params = [{transform_indices = @transform_0, window_bounds = array<i64: 8, 128>}, {pipeline_mode = #tpu.pipeline_mode<synchronous>, transform_indices = @transform_1, window_bounds = array<i64: 3, 128, 128>}, {pipeline_mode = #tpu.pipeline_mode<synchronous>, transform_indices = @transform_2, window_bounds = array<i64: 3, 1, 128>}, {transform_indices = @transform_3, window_bounds = array<i64: 8, 128>}]} {
    %c0 = arith.constant 0 : index
    %c0_0 = arith.constant 0 : index
    %0 = vector.load %arg1[%c0, %c0_0] : memref<8x128xf32, #tpu.memory_space<vmem>>, vector<8x128xf32>
    %c0_1 = arith.constant 0 : index
    %c0_2 = arith.constant 0 : index
    %c0_3 = arith.constant 0 : index
    %1 = vector.load %arg2[%c0_1, %c0_2, %c0_3] : memref<3x128x128xf32, #tpu.memory_space<vmem>>, vector<1x128x128xf32>
    %2 = vector.shape_cast %1 : vector<1x128x128xf32> to vector<128x128xf32>
    %c0_4 = arith.constant 0 : index
    %c0_5 = arith.constant 0 : index
    %c0_6 = arith.constant 0 : index
    %3 = vector.load %arg3[%c0_4, %c0_5, %c0_6] : memref<3x1x128xf32, #tpu.memory_space<vmem>>, vector<1x1x128xf32>
    %4 = vector.shape_cast %3 : vector<1x1x128xf32> to vector<1x128xf32>
    %cst = arith.constant dense<0.000000e+00> : vector<8x128xf32>
    %5 = tpu.matmul %0, %2, %cst {dimension_numbers = #tpu.dot_dimension_numbers<[1], [0], [0], [1], [0, 0, 1, 1], [], []>} : vector<8x128xf32>, vector<128x128xf32>, vector<8x128xf32> -> vector<8x128xf32>
    %6 = vector.broadcast %4 : vector<1x128xf32> to vector<8x128xf32>
    %7 = arith.addf %5, %6 : vector<8x128xf32>
    %cst_7 = arith.constant 0.000000e+00 : f32
    %8 = vector.broadcast %cst_7 : f32 to vector<8x128xf32>
    %9 = arith.maximumf %7, %8 : vector<8x128xf32>
    %c1 = arith.constant 1 : index
    %c0_8 = arith.constant 0 : index
    %c0_9 = arith.constant 0 : index
    %10 = vector.load %arg2[%c1, %c0_8, %c0_9] : memref<3x128x128xf32, #tpu.memory_space<vmem>>, vector<1x128x128xf32>
    %11 = vector.shape_cast %10 : vector<1x128x128xf32> to vector<128x128xf32>
    %c1_10 = arith.constant 1 : index
    %c0_11 = arith.constant 0 : index
    %c0_12 = arith.constant 0 : index
    %12 = vector.load %arg3[%c1_10, %c0_11, %c0_12] : memref<3x1x128xf32, #tpu.memory_space<vmem>>, vector<1x1x128xf32>
    %13 = vector.shape_cast %12 : vector<1x1x128xf32> to vector<1x128xf32>
    %cst_13 = arith.constant dense<0.000000e+00> : vector<8x128xf32>
    %14 = tpu.matmul %9, %11, %cst_13 {dimension_numbers = #tpu.dot_dimension_numbers<[1], [0], [0], [1], [0, 0, 1, 1], [], []>} : vector<8x128xf32>, vector<128x128xf32>, vector<8x128xf32> -> vector<8x128xf32>
    %15 = vector.broadcast %13 : vector<1x128xf32> to vector<8x128xf32>
    %16 = arith.addf %14, %15 : vector<8x128xf32>
    %cst_14 = arith.constant 0.000000e+00 : f32
    %17 = vector.broadcast %cst_14 : f32 to vector<8x128xf32>
    %18 = arith.maximumf %16, %17 : vector<8x128xf32>
    %c2 = arith.constant 2 : index
    %c0_15 = arith.constant 0 : index
    %c0_16 = arith.constant 0 : index
    %19 = vector.load %arg2[%c2, %c0_15, %c0_16] : memref<3x128x128xf32, #tpu.memory_space<vmem>>, vector<1x128x128xf32>
    %20 = vector.shape_cast %19 : vector<1x128x128xf32> to vector<128x128xf32>
    %c2_17 = arith.constant 2 : index
    %c0_18 = arith.constant 0 : index
    %c0_19 = arith.constant 0 : index
    %21 = vector.load %arg3[%c2_17, %c0_18, %c0_19] : memref<3x1x128xf32, #tpu.memory_space<vmem>>, vector<1x1x128xf32>
    %22 = vector.shape_cast %21 : vector<1x1x128xf32> to vector<1x128xf32>
    %cst_20 = arith.constant dense<0.000000e+00> : vector<8x128xf32>
    %23 = tpu.matmul %18, %20, %cst_20 {dimension_numbers = #tpu.dot_dimension_numbers<[1], [0], [0], [1], [0, 0, 1, 1], [], []>} : vector<8x128xf32>, vector<128x128xf32>, vector<8x128xf32> -> vector<8x128xf32>
    %24 = vector.broadcast %22 : vector<1x128xf32> to vector<8x128xf32>
    %25 = arith.addf %23, %24 : vector<8x128xf32>
    %c0_21 = arith.constant 0 : index
    %c0_22 = arith.constant 0 : index
    %26 = vector.load %arg4[%c0_21, %c0_22] : memref<8x128xf32, #tpu.memory_space<vmem>>, vector<8x128xf32>
    tpu.vector_store %arg4[%c0_21, %c0_22], %25 {strides = array<i32>} : memref<8x128xf32, #tpu.memory_space<vmem>>, vector<8x128xf32>,
    return
  }
  func.func @transform_0(%arg0: i32) -> (i32, i32) {
    %c0_i32 = arith.constant 0 : i32
    %c0_i32_0 = arith.constant 0 : i32
    return %arg0, %c0_i32 : i32, i32
  }
  func.func @transform_1(%arg0: i32) -> (i32, i32, i32) {
    %c0_i32 = arith.constant 0 : i32
    %c0_i32_0 = arith.constant 0 : i32
    %c0_i32_1 = arith.constant 0 : i32
    %c0_i32_2 = arith.constant 0 : i32
    return %c0_i32, %c0_i32_0, %c0_i32_1 : i32, i32, i32
  }
  func.func @transform_2(%arg0: i32) -> (i32, i32, i32) {
    %c0_i32 = arith.constant 0 : i32
    %c0_i32_0 = arith.constant 0 : i32
    %c0_i32_1 = arith.constant 0 : i32
    %c0_i32_2 = arith.constant 0 : i32
    return %c0_i32, %c0_i32_0, %c0_i32_1 : i32, i32, i32
  }
  func.func @transform_3(%arg0: i32) -> (i32, i32) {
    %c0_i32 = arith.constant 0 : i32
    %c0_i32_0 = arith.constant 0 : i32
    return %arg0, %c0_i32 : i32, i32
  }
}

</mosaic_0001>

<bundles_post_ra>
// kernel: tpu_custom_call.1
= control target key start
LH: loop header
LB: loop body
LE: loop exit
PB: predicated region body
PF: predicated region fallthrough
CT: control target
= control target key end

     0   :  { %8 = vsyncpa [#allocation3], 0  ;;  %s677_s0 = inlined_call_operand.hbm [shape: f32[8,128], index: 0, kind: input, shape index: {}]   ;;  %s678_s1 = inlined_call_operand.hbm [shape: f32[3,128,128], index: 1, kind: input, shape index: {}]   ;;  %s679_s2 = inlined_call_operand.vmem [shape: f32[3,1,128], index: 2, kind: input, shape index: {}]   ;;  %s680_s3 = inlined_call_operand.hbm [shape: f32[8,128], index: 3, kind: output, shape index: {}]  }
   0x1   :  { %9 = vsyncpa [#allocation6], 0 }
   0x2   :  { %10 = vsyncpa [#allocation4], 0  ;;  %s578_s12 = smov [#allocation2]   ;;  %s579_s14 = smov [#allocation5]  }
   0x3   :  { %s17_s13 = sshll.u32 %s578_s12, 4  ;;  %s26_s15 = sshll.u32 %s579_s14, 4  ;;  %s18_s13 = int_to_ptr.vmem [resolvable:$true] %s17_s13  ;;  %s27_s15 = int_to_ptr.vmem [resolvable:$true] %s26_s15 }
   0x4   :  { %s520_s16 = scalar_lea.vmem %s18_s13, 128  ;;  %p525_p1 = scmp.lt.s32.totalorder %s18_s13, %s18_s13 }
   0x5   :  { %p521_p0 = scmp.ne.s32.totalorder %s18_s13, %s520_s16  ;;  %p526_p2 = scmp.lt.s32.totalorder %s520_s16, %s520_s16 }
   0x7   :  { %p527_p3 = por %p526_p2, %p525_p1 }
   0x9   :  { %p528_p4 = pnand %p527_p3, %p521_p0 }
   0xb   :  { %531 = shalt.err (!%p528_p4)
}
   0xc   :  { %20 = dma.hbm_to_vmem [thread:$0]  %s677_s0, 128, %s18_s13, [#allocation3]  }
   0xd   :  { %s540_s19 = scalar_lea.vmem %s27_s15, 6144  ;;  %p545_p6 = scmp.lt.s32.totalorder %s27_s15, %s27_s15 }
   0xe   :  { %p541_p5 = scmp.ne.s32.totalorder %s27_s15, %s540_s19  ;;  %p546_p7 = scmp.lt.s32.totalorder %s540_s19, %s540_s19 }
  0x10   :  { %p547_p8 = por %p546_p7, %p545_p6 }
  0x12   :  { %p548_p9 = pnand %p547_p8, %p541_p5 }
  0x14   :  { %551 = shalt.err (!%p548_p9)
}
  0x15   :  { %s580_s20 = smov 128   ;;  %s581_s21 = smov 8  }
  0x16   :  { %32 = dma.hbm_to_vmem [thread:$0]  %s678_s1, 6144, %s27_s15, [#allocation6], %s580_s20, %s580_s20, %s581_s21  }
  0x17   :  { %572 = dma.done.wait [#allocation3], 128  }
  0x18   :  { %573 = vsyncadd [#allocation3], 4294967168 }
  0x19   :  { %574 = dma.done.wait [#allocation6], 6144  }
  0x1a   :  { %575 = vsyncadd [#allocation6], 4294961152  ;;  %v582_v0 = vmov 0.0   ;;  %vm583_vm0 = vmmov 0   ;;  %v57_v1 = vld [vmem:[#allocation5 + $0x78] sm:$0xff]  ;;  %v56_v2 = vld [vmem:[#allocation5 + $0x70] sm:$0xff] }
  0x1b   :  { %400 = vmatprep.subr.mxu0 %v582_v0  ;;  %432 = vmatprep.mubr.msk.f32.mxu0 %vm583_vm0, %v582_v0  ;;  %v55_v3 = vld [vmem:[#allocation5 + $0x68] sm:$0xff]  ;;  %v54_v4 = vld [vmem:[#allocation5 + $0x60] sm:$0xff]  ;;  %v152_v5 = vld [vmem:[#allocation5 + $0xf8] sm:$0xff]  ;;  %s584_s28 = smov [#allocation7]  }
  0x1c   :  { %435 = vmatprep.subr.mxu1 %v582_v0  ;;  %467 = vmatprep.mubr.msk.f32.mxu1 %vm583_vm0, %v582_v0  ;;  %v53_v6 = vld [vmem:[#allocation5 + $0x58] sm:$0xff]  ;;  %v151_v7 = vld [vmem:[#allocation5 + $0xf0] sm:$0xff]  ;;  %v150_v8 = vld [vmem:[#allocation5 + $0xe8] sm:$0xff]  ;;  %s334_s29 = sshll.u32 %s584_s28, 4  ;;  %s335_s29 = int_to_ptr.vmem [resolvable:$true] %s334_s29 }
  0x1d   :  { %401 = vmatpush3.msra.mxu0 %v57_v1  ;;  %436 = vmatpush3.msra.mxu1 %v152_v5  ;;  %v52_v9 = vld [vmem:[#allocation5 + $0x50] sm:$0xff]  ;;  %v149_v10 = vld [vmem:[#allocation5 + $0xe0] sm:$0xff]  ;;  %v51_v11 = vld [vmem:[#allocation5 + $0x48] sm:$0xff]  ;;  %s552_s30 = scalar_lea.vmem %s335_s29, 128  ;;  %p557_p11 = scmp.lt.s32.totalorder %s335_s29, %s335_s29 }
  0x1e   :  { %402 = vmatprep.subr.mxu0 %v582_v0  ;;  %437 = vmatprep.subr.mxu1 %v582_v0  ;;  %v148_v12 = vld [vmem:[#allocation5 + $0xd8] sm:$0xff]  ;;  %v50_v13 = vld [vmem:[#allocation5 + $0x40] sm:$0xff]  ;;  %v147_v14 = vld [vmem:[#allocation5 + $0xd0] sm:$0xff]  ;;  %p553_p10 = scmp.ne.s32.totalorder %s335_s29, %s552_s30  ;;  %p558_p12 = scmp.lt.s32.totalorder %s552_s30, %s552_s30 }
  0x1f   :  { %403 = vmatpush3.msra.mxu0 %v56_v2  ;;  %438 = vmatpush3.msra.mxu1 %v151_v7  ;;  %v49_v15 = vld [vmem:[#allocation5 + $0x38] sm:$0xff]  ;;  %v146_v16 = vld [vmem:[#allocation5 + $0xc8] sm:$0xff]  ;;  %v48_v17 = vld [vmem:[#allocation5 + $0x30] sm:$0xff] }
  0x20   :  { %404 = vmatprep.subr.mxu0 %v582_v0  ;;  %439 = vmatprep.subr.mxu1 %v582_v0  ;;  %v145_v18 = vld [vmem:[#allocation5 + $0xc0] sm:$0xff]  ;;  %v47_v19 = vld [vmem:[#allocation5 + $0x28] sm:$0xff]  ;;  %v144_v20 = vld [vmem:[#allocation5 + $0xb8] sm:$0xff]  ;;  %p559_p13 = por %p558_p12, %p557_p11 }
  0x21   :  { %405 = vmatpush3.msra.mxu0 %v55_v3  ;;  %440 = vmatpush3.msra.mxu1 %v150_v8  ;;  %v46_v21 = vld [vmem:[#allocation5 + $0x20] sm:$0xff]  ;;  %v143_v22 = vld [vmem:[#allocation5 + $0xb0] sm:$0xff]  ;;  %v45_v23 = vld [vmem:[#allocation5 + $0x18] sm:$0xff] }
  0x22   :  { %406 = vmatprep.subr.mxu0 %v582_v0  ;;  %441 = vmatprep.subr.mxu1 %v582_v0  ;;  %v142_v24 = vld [vmem:[#allocation5 + $0xa8] sm:$0xff]  ;;  %v44_v25 = vld [vmem:[#allocation5 + $0x10] sm:$0xff]  ;;  %v141_v26 = vld [vmem:[#allocation5 + $0xa0] sm:$0xff]  ;;  %p560_p0 = pnand %p559_p13, %p553_p10 }
  0x23   :  { %407 = vmatpush3.msra.mxu0 %v54_v4  ;;  %442 = vmatpush3.msra.mxu1 %v149_v10  ;;  %v43_v27 = vld [vmem:[#allocation5 + $0x8] sm:$0xff]  ;;  %v140_v28 = vld [vmem:[#allocation5 + $0x98] sm:$0xff]  ;;  %v42_v29 = vld [vmem:[#allocation5] sm:$0xff] }
  0x24   :  { %408 = vmatprep.subr.mxu0 %v582_v0  ;;  %443 = vmatprep.subr.mxu1 %v582_v0  ;;  %v41_v30 = vld [vmem:[#allocation2] sm:$0xff]  ;;  %v139_v31 = vld [vmem:[#allocation5 + $0x90] sm:$0xff]  ;;  %v138_v32 = vld [vmem:[#allocation5 + $0x88] sm:$0xff] }
  0x25   :  { %409 = vmatpush3.msra.mxu0 %v53_v6  ;;  %444 = vmatpush3.msra.mxu1 %v148_v12  ;;  %v137_v33 = vld [vmem:[#allocation5 + $0x80] sm:$0xff]  ;;  %v248_v34 = vld [vmem:[#allocation5 + $0x178] sm:$0xff]  ;;  %v247_v35 = vld [vmem:[#allocation5 + $0x170] sm:$0xff] }
  0x26   :  { %410 = vmatprep.subr.mxu0 %v582_v0  ;;  %445 = vmatprep.subr.mxu1 %v582_v0  ;;  %v246_v36 = vld [vmem:[#allocation5 + $0x168] sm:$0xff]  ;;  %v245_v37 = vld [vmem:[#allocation5 + $0x160] sm:$0xff]  ;;  %v244_v38 = vld [vmem:[#allocation5 + $0x158] sm:$0xff] }
  0x27   :  { %411 = vmatpush3.msra.mxu0 %v52_v9  ;;  %446 = vmatpush3.msra.mxu1 %v147_v14  ;;  %v243_v39 = vld [vmem:[#allocation5 + $0x150] sm:$0xff]  ;;  %v242_v40 = vld [vmem:[#allocation5 + $0x148] sm:$0xff]  ;;  %v241_v41 = vld [vmem:[#allocation5 + $0x140] sm:$0xff] }
  0x28   :  { %412 = vmatprep.subr.mxu0 %v582_v0  ;;  %447 = vmatprep.subr.mxu1 %v582_v0  ;;  %v240_v42 = vld [vmem:[#allocation5 + $0x138] sm:$0xff]  ;;  %v239_v43 = vld [vmem:[#allocation5 + $0x130] sm:$0xff]  ;;  %v238_v44 = vld [vmem:[#allocation5 + $0x128] sm:$0xff] }
  0x29   :  { %413 = vmatpush3.msra.mxu0 %v51_v11  ;;  %448 = vmatpush3.msra.mxu1 %v146_v16  ;;  %v237_v45 = vld [vmem:[#allocation5 + $0x120] sm:$0xff]  ;;  %v236_v46 = vld [vmem:[#allocation5 + $0x118] sm:$0xff]  ;;  %v235_v52 = vld [vmem:[#allocation5 + $0x110] sm:$0xff] }
  0x2a   :  { %414 = vmatprep.subr.mxu0 %v582_v0  ;;  %449 = vmatprep.subr.mxu1 %v582_v0  ;;  %v344_v47 = vld [vmem:[%s679_s2] ss:$0 sm:$0xff]  ;;  %v234_v53 = vld [vmem:[#allocation5 + $0x108] sm:$0xff]  ;;  %v233_v54 = vld [vmem:[#allocation5 + $0x100] sm:$0xff] }
  0x2b   :  { %415 = vmatpush3.msra.mxu0 %v50_v13  ;;  %450 = vmatpush3.msra.mxu1 %v145_v18  ;;  %v346_v55 = vld [vmem:[%s679_s2 + $0x1] ss:$0 sm:$0xff]  ;;  %v348_v60 = vld [vmem:[%s679_s2 + $0x2] ss:$0 sm:$0xff] }
  0x2c   :  { %416 = vmatprep.subr.mxu0 %v582_v0  ;;  %451 = vmatprep.subr.mxu1 %v582_v0 }
  0x2d   :  { %417 = vmatpush3.msra.mxu0 %v49_v15  ;;  %452 = vmatpush3.msra.mxu1 %v144_v20 }
  0x2e   :  { %418 = vmatprep.subr.mxu0 %v582_v0  ;;  %453 = vmatprep.subr.mxu1 %v582_v0 }
  0x2f   :  { %419 = vmatpush3.msra.mxu0 %v48_v17  ;;  %454 = vmatpush3.msra.mxu1 %v143_v22 }
  0x30   :  { %420 = vmatprep.subr.mxu0 %v582_v0  ;;  %455 = vmatprep.subr.mxu1 %v582_v0 }
  0x31   :  { %421 = vmatpush3.msra.mxu0 %v47_v19  ;;  %456 = vmatpush3.msra.mxu1 %v142_v24 }
  0x32   :  { %422 = vmatprep.subr.mxu0 %v582_v0  ;;  %457 = vmatprep.subr.mxu1 %v582_v0 }
  0x33   :  { %423 = vmatpush3.msra.mxu0 %v46_v21  ;;  %458 = vmatpush3.msra.mxu1 %v141_v26 }
  0x34   :  { %424 = vmatprep.subr.mxu0 %v582_v0  ;;  %459 = vmatprep.subr.mxu1 %v582_v0 }
  0x35   :  { %425 = vmatpush3.msra.mxu0 %v45_v23  ;;  %460 = vmatpush3.msra.mxu1 %v140_v28 }
  0x36   :  { %426 = vmatprep.subr.mxu0 %v582_v0  ;;  %461 = vmatprep.subr.mxu1 %v582_v0 }
  0x37   :  { %427 = vmatpush3.msra.mxu0 %v44_v25  ;;  %462 = vmatpush3.msra.mxu1 %v139_v31 }
  0x38   :  { %428 = vmatprep.subr.mxu0 %v582_v0  ;;  %463 = vmatprep.subr.mxu1 %v582_v0 }
  0x39   :  { %429 = vmatpush3.msra.mxu0 %v43_v27  ;;  %464 = vmatpush3.msra.mxu1 %v138_v32 }
  0x3a   :  { %430 = vmatprep.subr.mxu0 %v582_v0  ;;  %465 = vmatprep.subr.mxu1 %v582_v0 }
  0x3b   :  { %431 = vmatpush3.msra.mxu0 %v42_v29  ;;  %466 = vmatpush3.msra.mxu1 %v137_v33 }
  0x3c   :  { %433 = vmatmul.mubr.f32.vlgmr.msra.gmra.mxu0 %v41_v30  ;;  %470 = vmatprep.subr.mxu0 %v582_v0 }
  0x3d   :  { %502 = vmatprep.mubr.msk.f32.mxu0 %vm583_vm0, %v582_v0  ;;  %471 = vmatpush3.msra.mxu0 %v248_v34 }
  0x3e   :  { %472 = vmatprep.subr.mxu0 %v582_v0 }
  0x3f   :  { %473 = vmatpush3.msra.mxu0 %v247_v35 }
  0x40   :  { %474 = vmatprep.subr.mxu0 %v582_v0 }
  0x41   :  { %475 = vmatpush3.msra.mxu0 %v246_v36 }
  0x42   :  { %476 = vmatprep.subr.mxu0 %v582_v0 }
  0x43   :  { %477 = vmatpush3.msra.mxu0 %v245_v37 }
  0x44   :  { %478 = vmatprep.subr.mxu0 %v582_v0 }
  0x45   :  { %479 = vmatpush3.msra.mxu0 %v244_v38 }
  0x46   :  { %480 = vmatprep.subr.mxu0 %v582_v0 }
  0x47   :  { %481 = vmatpush3.msra.mxu0 %v243_v39 }
  0x48   :  { %482 = vmatprep.subr.mxu0 %v582_v0 }
  0x49   :  { %483 = vmatpush3.msra.mxu0 %v242_v40 }
  0x4a   :  { %484 = vmatprep.subr.mxu0 %v582_v0 }
  0x4b   :  { %485 = vmatpush3.msra.mxu0 %v241_v41 }
  0x4c   :  { %486 = vmatprep.subr.mxu0 %v582_v0 }
  0x4d   :  { %487 = vmatpush3.msra.mxu0 %v240_v42 }
  0x4e   :  { %488 = vmatprep.subr.mxu0 %v582_v0 }
  0x4f   :  { %489 = vmatpush3.msra.mxu0 %v239_v43 }
  0x50   :  { %490 = vmatprep.subr.mxu0 %v582_v0 }
  0x51   :  { %491 = vmatpush3.msra.mxu0 %v238_v44 }
  0x52   :  { %492 = vmatprep.subr.mxu0 %v582_v0 }
  0x53   :  { %493 = vmatpush3.msra.mxu0 %v237_v45 }
  0x54   :  { %494 = vmatprep.subr.mxu0 %v582_v0 }
  0x55   :  { %495 = vmatpush3.msra.mxu0 %v236_v46 }
  0x56   :  { %496 = vmatprep.subr.mxu0 %v582_v0 }
  0x57   :  { %497 = vmatpush3.msra.mxu0 %v235_v52 }
  0x58   :  { %498 = vmatprep.subr.mxu0 %v582_v0 }
  0x59   :  { %499 = vmatpush3.msra.mxu0 %v234_v53 }
  0x5a   :  { %500 = vmatprep.subr.mxu0 %v582_v0 }
  0x5b   :  { %501 = vmatpush3.msra.mxu0 %v233_v54 }
  0xfc   :  { %v131_v48 = vpop.f32.mrf.mxu0 }
  0xfd   :  { %v132_v49 = vadd.f32 %v344_v47, %v131_v48 }
  0xfe   :  { %v434_v50 = vpop.f32.mrf.mxu0 }
  0xff   :  { %v135_v51 = vmax.f32 %v132_v49, 0.0 }
 0x101   :  { %468 = vmatmul.mubr.f32.vlgmr.msra.gmra.mxu1 %v135_v51 }
 0x1c1   :  { %v227_v56 = vpop.f32.mrf.mxu1 }
 0x1c2   :  { %v228_v57 = vadd.f32 %v346_v55, %v227_v56 }
 0x1c3   :  { %v469_v58 = vpop.f32.mrf.mxu1 }
 0x1c4   :  { %v231_v59 = vmax.f32 %v228_v57, 0.0 }
 0x1c6   :  { %503 = vmatmul.mubr.f32.vlgmr.msra.gmra.mxu0 %v231_v59 }
 0x286   :  { %v323_v61 = vpop.f32.mrf.mxu0 }
 0x287   :  { %v324_v62 = vadd.f32 %v348_v60, %v323_v61 }
 0x288   :  { %v504_v63 = vpop.f32.mrf.mxu0 }
 0x289   :  { %327 = vst [vmem:[#allocation7] sm:$0xff] %v324_v62 }
 0x28a   :  { %563 = shalt.err (!%p560_p0)
}
 0x28b   :  { %337 = dma.vmem_to_hbm [thread:$0]  %s335_s29, 128, %s680_s3, [#allocation4]  }
 0x28c   :  { %576 = dma.done.wait [#allocation4], 128  }
 0x28d   :  { %577 = vsyncadd [#allocation4], 4294967168 }
 0x28e   :  { %341 = vsyncpa [#allocation3], 1 }
 0x28f   :  { %342 = vsyncpa [#allocation6], 1 }
 0x290   :  { %343 = vsyncpa [#allocation4], 1 }

// kernel: tpu_custom_call.1
= control target key start
LH: loop header
LB: loop body
LE: loop exit
PB: predicated region body
PF: predicated region fallthrough
CT: control target
= control target key end

     0   :  { %8 = vsyncpa [#allocation3], 0  ;;  %s677_s0 = inlined_call_operand.hbm [shape: f32[8,128], index: 0, kind: input, shape index: {}]   ;;  %s678_s1 = inlined_call_operand.hbm [shape: f32[3,128,128], index: 1, kind: input, shape index: {}]   ;;  %s679_s2 = inlined_call_operand.vmem [shape: f32[3,1,128], index: 2, kind: input, shape index: {}]   ;;  %s680_s3 = inlined_call_operand.hbm [shape: f32[8,128], index: 3, kind: output, shape index: {}]  }
   0x1   :  { %9 = vsyncpa [#allocation6], 0 }
   0x2   :  { %10 = vsyncpa [#allocation4], 0  ;;  %s578_s12 = smov [#allocation2]   ;;  %s579_s14 = smov [#allocation5]  }
   0x3   :  { %s17_s13 = sshll.u32 %s578_s12, 4  ;;  %s26_s15 = sshll.u32 %s579_s14, 4  ;;  %s18_s13 = int_to_ptr.vmem [resolvable:$true] %s17_s13  ;;  %s27_s15 = int_to_ptr.vmem [resolvable:$true] %s26_s15 }
   0x4   :  { %s520_s16 = scalar_lea.vmem %s18_s13, 128  ;;  %p525_p1 = scmp.lt.s32.totalorder %s18_s13, %s18_s13 }
   0x5   :  { %p521_p0 = scmp.ne.s32.totalorder %s18_s13, %s520_s16  ;;  %p526_p2 = scmp.lt.s32.totalorder %s520_s16, %s520_s16 }
   0x7   :  { %p527_p3 = por %p526_p2, %p525_p1 }
   0x9   :  { %p528_p4 = pnand %p527_p3, %p521_p0 }
   0xb   :  { %531 = shalt.err (!%p528_p4)
}
   0xc   :  { %20 = dma.hbm_to_vmem [thread:$0]  %s677_s0, 128, %s18_s13, [#allocation3]  }
   0xd   :  { %s540_s19 = scalar_lea.vmem %s27_s15, 6144  ;;  %p545_p6 = scmp.lt.s32.totalorder %s27_s15, %s27_s15 }
   0xe   :  { %p541_p5 = scmp.ne.s32.totalorder %s27_s15, %s540_s19  ;;  %p546_p7 = scmp.lt.s32.totalorder %s540_s19, %s540_s19 }
  0x10   :  { %p547_p8 = por %p546_p7, %p545_p6 }
  0x12   :  { %p548_p9 = pnand %p547_p8, %p541_p5 }
  0x14   :  { %551 = shalt.err (!%p548_p9)
}
  0x15   :  { %s580_s20 = smov 128   ;;  %s581_s21 = smov 8  }
  0x16   :  { %32 = dma.hbm_to_vmem [thread:$0]  %s678_s1, 6144, %s27_s15, [#allocation6], %s580_s20, %s580_s20, %s581_s21  }
  0x17   :  { %572 = dma.done.wait [#allocation3], 128  }
  0x18   :  { %573 = vsyncadd [#allocation3], 4294967168 }
  0x19   :  { %574 = dma.done.wait [#allocation6], 6144  }
  0x1a   :  { %575 = vsyncadd [#allocation6], 4294961152  ;;  %v582_v0 = vmov 0.0   ;;  %vm583_vm0 = vmmov 0   ;;  %v57_v1 = vld [vmem:[#allocation5 + $0x78] sm:$0xff]  ;;  %v56_v2 = vld [vmem:[#allocation5 + $0x70] sm:$0xff] }
  0x1b   :  { %400 = vmatprep.subr.mxu0 %v582_v0  ;;  %432 = vmatprep.mubr.msk.f32.mxu0 %vm583_vm0, %v582_v0  ;;  %v55_v3 = vld [vmem:[#allocation5 + $0x68] sm:$0xff]  ;;  %v54_v4 = vld [vmem:[#allocation5 + $0x60] sm:$0xff]  ;;  %v152_v5 = vld [vmem:[#allocation5 + $0xf8] sm:$0xff]  ;;  %s584_s28 = smov [#allocation7]  }
  0x1c   :  { %435 = vmatprep.subr.mxu1 %v582_v0  ;;  %467 = vmatprep.mubr.msk.f32.mxu1 %vm583_vm0, %v582_v0  ;;  %v53_v6 = vld [vmem:[#allocation5 + $0x58] sm:$0xff]  ;;  %v151_v7 = vld [vmem:[#allocation5 + $0xf0] sm:$0xff]  ;;  %v150_v8 = vld [vmem:[#allocation5 + $0xe8] sm:$0xff]  ;;  %s334_s29 = sshll.u32 %s584_s28, 4  ;;  %s335_s29 = int_to_ptr.vmem [resolvable:$true] %s334_s29 }
  0x1d   :  { %401 = vmatpush3.msra.mxu0 %v57_v1  ;;  %436 = vmatpush3.msra.mxu1 %v152_v5  ;;  %v52_v9 = vld [vmem:[#allocation5 + $0x50] sm:$0xff]  ;;  %v149_v10 = vld [vmem:[#allocation5 + $0xe0] sm:$0xff]  ;;  %v51_v11 = vld [vmem:[#allocation5 + $0x48] sm:$0xff]  ;;  %s552_s30 = scalar_lea.vmem %s335_s29, 128  ;;  %p557_p11 = scmp.lt.s32.totalorder %s335_s29, %s335_s29 }
  0x1e   :  { %402 = vmatprep.subr.mxu0 %v582_v0  ;;  %437 = vmatprep.subr.mxu1 %v582_v0  ;;  %v148_v12 = vld [vmem:[#allocation5 + $0xd8] sm:$0xff]  ;;  %v50_v13 = vld [vmem:[#allocation5 + $0x40] sm:$0xff]  ;;  %v147_v14 = vld [vmem:[#allocation5 + $0xd0] sm:$0xff]  ;;  %p553_p10 = scmp.ne.s32.totalorder %s335_s29, %s552_s30  ;;  %p558_p12 = scmp.lt.s32.totalorder %s552_s30, %s552_s30 }
  0x1f   :  { %403 = vmatpush3.msra.mxu0 %v56_v2  ;;  %438 = vmatpush3.msra.mxu1 %v151_v7  ;;  %v49_v15 = vld [vmem:[#allocation5 + $0x38] sm:$0xff]  ;;  %v146_v16 = vld [vmem:[#allocation5 + $0xc8] sm:$0xff]  ;;  %v48_v17 = vld [vmem:[#allocation5 + $0x30] sm:$0xff] }
  0x20   :  { %404 = vmatprep.subr.mxu0 %v582_v0  ;;  %439 = vmatprep.subr.mxu1 %v582_v0  ;;  %v145_v18 = vld [vmem:[#allocation5 + $0xc0] sm:$0xff]  ;;  %v47_v19 = vld [vmem:[#allocation5 + $0x28] sm:$0xff]  ;;  %v144_v20 = vld [vmem:[#allocation5 + $0xb8] sm:$0xff]  ;;  %p559_p13 = por %p558_p12, %p557_p11 }
  0x21   :  { %405 = vmatpush3.msra.mxu0 %v55_v3  ;;  %440 = vmatpush3.msra.mxu1 %v150_v8  ;;  %v46_v21 = vld [vmem:[#allocation5 + $0x20] sm:$0xff]  ;;  %v143_v22 = vld [vmem:[#allocation5 + $0xb0] sm:$0xff]  ;;  %v45_v23 = vld [vmem:[#allocation5 + $0x18] sm:$0xff] }
  0x22   :  { %406 = vmatprep.subr.mxu0 %v582_v0  ;;  %441 = vmatprep.subr.mxu1 %v582_v0  ;;  %v142_v24 = vld [vmem:[#allocation5 + $0xa8] sm:$0xff]  ;;  %v44_v25 = vld [vmem:[#allocation5 + $0x10] sm:$0xff]  ;;  %v141_v26 = vld [vmem:[#allocation5 + $0xa0] sm:$0xff]  ;;  %p560_p0 = pnand %p559_p13, %p553_p10 }
  0x23   :  { %407 = vmatpush3.msra.mxu0 %v54_v4  ;;  %442 = vmatpush3.msra.mxu1 %v149_v10  ;;  %v43_v27 = vld [vmem:[#allocation5 + $0x8] sm:$0xff]  ;;  %v140_v28 = vld [vmem:[#allocation5 + $0x98] sm:$0xff]  ;;  %v42_v29 = vld [vmem:[#allocation5] sm:$0xff] }
  0x24   :  { %408 = vmatprep.subr.mxu0 %v582_v0  ;;  %443 = vmatprep.subr.mxu1 %v582_v0  ;;  %v41_v30 = vld [vmem:[#allocation2] sm:$0xff]  ;;  %v139_v31 = vld [vmem:[#allocation5 + $0x90] sm:$0xff]  ;;  %v138_v32 = vld [vmem:[#allocation5 + $0x88] sm:$0xff] }
  0x25   :  { %409 = vmatpush3.msra.mxu0 %v53_v6  ;;  %444 = vmatpush3.msra.mxu1 %v148_v12  ;;  %v137_v33 = vld [vmem:[#allocation5 + $0x80] sm:$0xff]  ;;  %v248_v34 = vld [vmem:[#allocation5 + $0x178] sm:$0xff]  ;;  %v247_v35 = vld [vmem:[#allocation5 + $0x170] sm:$0xff] }
  0x26   :  { %410 = vmatprep.subr.mxu0 %v582_v0  ;;  %445 = vmatprep.subr.mxu1 %v582_v0  ;;  %v246_v36 = vld [vmem:[#allocation5 + $0x168] sm:$0xff]  ;;  %v245_v37 = vld [vmem:[#allocation5 + $0x160] sm:$0xff]  ;;  %v244_v38 = vld [vmem:[#allocation5 + $0x158] sm:$0xff] }
  0x27   :  { %411 = vmatpush3.msra.mxu0 %v52_v9  ;;  %446 = vmatpush3.msra.mxu1 %v147_v14  ;;  %v243_v39 = vld [vmem:[#allocation5 + $0x150] sm:$0xff]  ;;  %v242_v40 = vld [vmem:[#allocation5 + $0x148] sm:$0xff]  ;;  %v241_v41 = vld [vmem:[#allocation5 + $0x140] sm:$0xff] }
  0x28   :  { %412 = vmatprep.subr.mxu0 %v582_v0  ;;  %447 = vmatprep.subr.mxu1 %v582_v0  ;;  %v240_v42 = vld [vmem:[#allocation5 + $0x138] sm:$0xff]  ;;  %v239_v43 = vld [vmem:[#allocation5 + $0x130] sm:$0xff]  ;;  %v238_v44 = vld [vmem:[#allocation5 + $0x128] sm:$0xff] }
  0x29   :  { %413 = vmatpush3.msra.mxu0 %v51_v11  ;;  %448 = vmatpush3.msra.mxu1 %v146_v16  ;;  %v237_v45 = vld [vmem:[#allocation5 + $0x120] sm:$0xff]  ;;  %v236_v46 = vld [vmem:[#allocation5 + $0x118] sm:$0xff]  ;;  %v235_v52 = vld [vmem:[#allocation5 + $0x110] sm:$0xff] }
  0x2a   :  { %414 = vmatprep.subr.mxu0 %v582_v0  ;;  %449 = vmatprep.subr.mxu1 %v582_v0  ;;  %v344_v47 = vld [vmem:[%s679_s2] ss:$0 sm:$0xff]  ;;  %v234_v53 = vld [vmem:[#allocation5 + $0x108] sm:$0xff]  ;;  %v233_v54 = vld [vmem:[#allocation5 + $0x100] sm:$0xff] }
  0x2b   :  { %415 = vmatpush3.msra.mxu0 %v50_v13  ;;  %450 = vmatpush3.msra.mxu1 %v145_v18  ;;  %v346_v55 = vld [vmem:[%s679_s2 + $0x1] ss:$0 sm:$0xff]  ;;  %v348_v60 = vld [vmem:[%s679_s2 + $0x2] ss:$0 sm:$0xff] }
  0x2c   :  { %416 = vmatprep.subr.mxu0 %v582_v0  ;;  %451 = vmatprep.subr.mxu1 %v582_v0 }
  0x2d   :  { %417 = vmatpush3.msra.mxu0 %v49_v15  ;;  %452 = vmatpush3.msra.mxu1 %v144_v20 }
  0x2e   :  { %418 = vmatprep.subr.mxu0 %v582_v0  ;;  %453 = vmatprep.subr.mxu1 %v582_v0 }
  0x2f   :  { %419 = vmatpush3.msra.mxu0 %v48_v17  ;;  %454 = vmatpush3.msra.mxu1 %v143_v22 }
  0x30   :  { %420 = vmatprep.subr.mxu0 %v582_v0  ;;  %455 = vmatprep.subr.mxu1 %v582_v0 }
  0x31   :  { %421 = vmatpush3.msra.mxu0 %v47_v19  ;;  %456 = vmatpush3.msra.mxu1 %v142_v24 }
  0x32   :  { %422 = vmatprep.subr.mxu0 %v582_v0  ;;  %457 = vmatprep.subr.mxu1 %v582_v0 }
  0x33   :  { %423 = vmatpush3.msra.mxu0 %v46_v21  ;;  %458 = vmatpush3.msra.mxu1 %v141_v26 }
  0x34   :  { %424 = vmatprep.subr.mxu0 %v582_v0  ;;  %459 = vmatprep.subr.mxu1 %v582_v0 }
  0x35   :  { %425 = vmatpush3.msra.mxu0 %v45_v23  ;;  %460 = vmatpush3.msra.mxu1 %v140_v28 }
  0x36   :  { %426 = vmatprep.subr.mxu0 %v582_v0  ;;  %461 = vmatprep.subr.mxu1 %v582_v0 }
  0x37   :  { %427 = vmatpush3.msra.mxu0 %v44_v25  ;;  %462 = vmatpush3.msra.mxu1 %v139_v31 }
  0x38   :  { %428 = vmatprep.subr.mxu0 %v582_v0  ;;  %463 = vmatprep.subr.mxu1 %v582_v0 }
  0x39   :  { %429 = vmatpush3.msra.mxu0 %v43_v27  ;;  %464 = vmatpush3.msra.mxu1 %v138_v32 }
  0x3a   :  { %430 = vmatprep.subr.mxu0 %v582_v0  ;;  %465 = vmatprep.subr.mxu1 %v582_v0 }
  0x3b   :  { %431 = vmatpush3.msra.mxu0 %v42_v29  ;;  %466 = vmatpush3.msra.mxu1 %v137_v33 }
  0x3c   :  { %433 = vmatmul.mubr.f32.vlgmr.msra.gmra.mxu0 %v41_v30  ;;  %470 = vmatprep.subr.mxu0 %v582_v0 }
  0x3d   :  { %502 = vmatprep.mubr.msk.f32.mxu0 %vm583_vm0, %v582_v0  ;;  %471 = vmatpush3.msra.mxu0 %v248_v34 }
  0x3e   :  { %472 = vmatprep.subr.mxu0 %v582_v0 }
  0x3f   :  { %473 = vmatpush3.msra.mxu0 %v247_v35 }
  0x40   :  { %474 = vmatprep.subr.mxu0 %v582_v0 }
  0x41   :  { %475 = vmatpush3.msra.mxu0 %v246_v36 }
  0x42   :  { %476 = vmatprep.subr.mxu0 %v582_v0 }
  0x43   :  { %477 = vmatpush3.msra.mxu0 %v245_v37 }
  0x44   :  { %478 = vmatprep.subr.mxu0 %v582_v0 }
  0x45   :  { %479 = vmatpush3.msra.mxu0 %v244_v38 }
  0x46   :  { %480 = vmatprep.subr.mxu0 %v582_v0 }
  0x47   :  { %481 = vmatpush3.msra.mxu0 %v243_v39 }
  0x48   :  { %482 = vmatprep.subr.mxu0 %v582_v0 }
  0x49   :  { %483 = vmatpush3.msra.mxu0 %v242_v40 }
  0x4a   :  { %484 = vmatprep.subr.mxu0 %v582_v0 }
  0x4b   :  { %485 = vmatpush3.msra.mxu0 %v241_v41 }
  0x4c   :  { %486 = vmatprep.subr.mxu0 %v582_v0 }
  0x4d   :  { %487 = vmatpush3.msra.mxu0 %v240_v42 }
  0x4e   :  { %488 = vmatprep.subr.mxu0 %v582_v0 }
  0x4f   :  { %489 = vmatpush3.msra.mxu0 %v239_v43 }
  0x50   :  { %490 = vmatprep.subr.mxu0 %v582_v0 }
  0x51   :  { %491 = vmatpush3.msra.mxu0 %v238_v44 }
  0x52   :  { %492 = vmatprep.subr.mxu0 %v582_v0 }
  0x53   :  { %493 = vmatpush3.msra.mxu0 %v237_v45 }
  0x54   :  { %494 = vmatprep.subr.mxu0 %v582_v0 }
  0x55   :  { %495 = vmatpush3.msra.mxu0 %v236_v46 }
  0x56   :  { %496 = vmatprep.subr.mxu0 %v582_v0 }
  0x57   :  { %497 = vmatpush3.msra.mxu0 %v235_v52 }
  0x58   :  { %498 = vmatprep.subr.mxu0 %v582_v0 }
  0x59   :  { %499 = vmatpush3.msra.mxu0 %v234_v53 }
  0x5a   :  { %500 = vmatprep.subr.mxu0 %v582_v0 }
  0x5b   :  { %501 = vmatpush3.msra.mxu0 %v233_v54 }
  0xfc   :  { %v131_v48 = vpop.f32.mrf.mxu0 }
  0xfd   :  { %v132_v49 = vadd.f32 %v344_v47, %v131_v48 }
  0xfe   :  { %v434_v50 = vpop.f32.mrf.mxu0 }
  0xff   :  { %v135_v51 = vmax.f32 %v132_v49, 0.0 }
 0x101   :  { %468 = vmatmul.mubr.f32.vlgmr.msra.gmra.mxu1 %v135_v51 }
 0x1c1   :  { %v227_v56 = vpop.f32.mrf.mxu1 }
 0x1c2   :  { %v228_v57 = vadd.f32 %v346_v55, %v227_v56 }
 0x1c3   :  { %v469_v58 = vpop.f32.mrf.mxu1 }
 0x1c4   :  { %v231_v59 = vmax.f32 %v228_v57, 0.0 }
 0x1c6   :  { %503 = vmatmul.mubr.f32.vlgmr.msra.gmra.mxu0 %v231_v59 }
 0x286   :  { %v323_v61 = vpop.f32.mrf.mxu0 }
 0x287   :  { %v324_v62 = vadd.f32 %v348_v60, %v323_v61 }
 0x288   :  { %v504_v63 = vpop.f32.mrf.mxu0 }
 0x289   :  { %327 = vst [vmem:[#allocation7] sm:$0xff] %v324_v62 }
 0x28a   :  { %563 = shalt.err (!%p560_p0)
}
 0x28b   :  { %337 = dma.vmem_to_hbm [thread:$0]  %s335_s29, 128, %s680_s3, [#allocation4]  }
 0x28c   :  { %576 = dma.done.wait [#allocation4], 128  }
 0x28d   :  { %577 = vsyncadd [#allocation4], 4294967168 }
 0x28e   :  { %341 = vsyncpa [#allocation3], 1 }
 0x28f   :  { %342 = vsyncpa [#allocation6], 1 }
 0x290   :  { %343 = vsyncpa [#allocation4], 1 }

</bundles_post_ra>
